<compile_context>
chip_gen: v6e
topology: v6e:2x2x1
jax: 0.10.0
libtpu: 0.0.40
codegen_flags: <defaults>
</compile_context>

<pallas_src>
import math

import jax
import jax.numpy as jnp
from jax.experimental import pallas as pl
from jax.experimental.pallas import tpu as pltpu

# ---- hyper-params (match the module's __init__ contract) --------------------
STATE_DIM = 16
HIDDEN_SIZE = 32
ACTION_DIM = 8
ACTION_BOUND = 1.0
BOUND_METHOD = "tanh"          # 'tanh' or 'clip'
LOG_SIGMA_BOUND = (-20.0, 2.0)

DEFAULT_BLOCK_ROWS = 2048      # production batch tile (multiple of 8)


def _bound(a):
    if BOUND_METHOD == "tanh":
        return ACTION_BOUND * jnp.tanh(a)
    return jnp.clip(a, -ACTION_BOUND, ACTION_BOUND)


def _mlp(x_ref, w1_ref, b1_ref, w2_ref, b2_ref):
    """preprocess_net: Linear -> ReLU -> Linear -> ReLU (MXU, f32 accumulate)."""
    h1 = jnp.dot(x_ref[...], w1_ref[...],
                 preferred_element_type=jnp.float32) + b1_ref[...]
    h1 = jnp.maximum(h1, 0.0)
    h2 = jnp.dot(h1, w2_ref[...],
                 preferred_element_type=jnp.float32) + b2_ref[...]
    return jnp.maximum(h2, 0.0)


def _actor_det_kernel(x_ref, w1_ref, b1_ref, w2_ref, b2_ref,
                      wmu_ref, bmu_ref, out_ref):
    """Deterministic path: actions = bound(mu(preprocess(x)))."""
    h2 = _mlp(x_ref, w1_ref, b1_ref, w2_ref, b2_ref)
    mu = jnp.dot(h2, wmu_ref[...],
                 preferred_element_type=jnp.float32) + bmu_ref[...]
    out_ref[...] = _bound(mu).astype(out_ref.dtype)


def _actor_stoch_kernel(x_ref, eps_ref, w1_ref, b1_ref, w2_ref, b2_ref,
                        wmu_ref, bmu_ref, wsg_ref, bsg_ref, out_ref):
    """Stochastic path: actions = bound(mu + exp(clip(log_sigma)) * eps)."""
    h2 = _mlp(x_ref, w1_ref, b1_ref, w2_ref, b2_ref)
    mu = jnp.dot(h2, wmu_ref[...],
                 preferred_element_type=jnp.float32) + bmu_ref[...]
    log_sigma = jnp.dot(h2, wsg_ref[...],
                        preferred_element_type=jnp.float32) + bsg_ref[...]
    log_sigma = jnp.clip(log_sigma, LOG_SIGMA_BOUND[0], LOG_SIGMA_BOUND[1])
    a = mu + jnp.exp(log_sigma) * eps_ref[...]
    out_ref[...] = _bound(a).astype(out_ref.dtype)


def gaussian_actor_forward(states, params, *, deterministic, eps=None,
                           block_rows=DEFAULT_BLOCK_ROWS):
    """states: [B, STATE_DIM] f32 -> bounded actions [B, ACTION_DIM] f32.

    `eps` ([B, ACTION_DIM] standard-normal draws) is required when
    deterministic=False; this keeps results independent of the batch tiling.
    """
    B = states.shape[0]
    w1, b1, w2, b2, wmu, bmu, wsg, bsg = params

    # Row tile: multiple of 8 (sublane), no larger than the (rounded-up) batch.
    tb = min(block_rows, -(-B // 8) * 8)
    tb = max(8, (tb // 8) * 8)
    n_tiles = -(-B // tb)
    b_pad = n_tiles * tb
    if b_pad != B:
        states = jnp.pad(states, ((0, b_pad - B), (0, 0)))

    row_tile = lambda i: (i, 0)
    const2 = lambda i: (0, 0)   # weights/biases: same block every step (resident)

    weight_specs = [
        pl.BlockSpec((STATE_DIM, HIDDEN_SIZE), const2),    # w1
        pl.BlockSpec((1, HIDDEN_SIZE), const2),            # b1
        pl.BlockSpec((HIDDEN_SIZE, HIDDEN_SIZE), const2),  # w2
        pl.BlockSpec((1, HIDDEN_SIZE), const2),            # b2
        pl.BlockSpec((HIDDEN_SIZE, ACTION_DIM), const2),   # w_mu
        pl.BlockSpec((1, ACTION_DIM), const2),             # b_mu
    ]
    out_shape = jax.ShapeDtypeStruct((b_pad, ACTION_DIM), jnp.float32)
    out_spec = pl.BlockSpec((tb, ACTION_DIM), row_tile)
    cparams = pltpu.CompilerParams(
        dimension_semantics=("parallel",))   # pipelined; megacore split on v7x

    if deterministic:
        out = pl.pallas_call(
            _actor_det_kernel,
            out_shape=out_shape,
            grid=(n_tiles,),
            in_specs=[pl.BlockSpec((tb, STATE_DIM), row_tile)] + weight_specs,
            out_specs=out_spec,
            compiler_params=cparams,
        )(states, w1, b1, w2, b2, wmu, bmu)
    else:
        assert eps is not None and eps.shape == (B, ACTION_DIM), \
            "stochastic forward needs eps of shape [B, ACTION_DIM]"
        eps = eps.astype(jnp.float32)
        if b_pad != B:
            eps = jnp.pad(eps, ((0, b_pad - B), (0, 0)))
        out = pl.pallas_call(
            _actor_stoch_kernel,
            out_shape=out_shape,
            grid=(n_tiles,),
            in_specs=([pl.BlockSpec((tb, STATE_DIM), row_tile),
                       pl.BlockSpec((tb, ACTION_DIM), row_tile)]
                      + weight_specs
                      + [pl.BlockSpec((HIDDEN_SIZE, ACTION_DIM), const2),  # w_sigma
                         pl.BlockSpec((1, ACTION_DIM), const2)]),          # b_sigma
            out_specs=out_spec,
            compiler_params=cparams,
        )(states, eps, w1, b1, w2, b2, wmu, bmu, wsg, bsg)

    return out[:B]


def reference_forward(states, params, *, deterministic, eps=None):
    """Pure-JAX reference (also the preferred path for tiny batches)."""
    w1, b1, w2, b2, wmu, bmu, wsg, bsg = params
    h1 = jax.nn.relu(states @ w1 + b1)
    h2 = jax.nn.relu(h1 @ w2 + b2)
    mu = h2 @ wmu + bmu
    if deterministic:
        a = mu
    else:
        log_sigma = jnp.clip(h2 @ wsg + bsg,
                             LOG_SIGMA_BOUND[0], LOG_SIGMA_BOUND[1])
        a = mu + jnp.exp(log_sigma) * eps
    return _bound(a)


def init_params(key):
    """Deterministic synthetic init mirroring orthogonal_init in the module."""
    k1, k2, k3, k4, k5 = jax.random.split(key, 5)
    ortho = jax.nn.initializers.orthogonal
    gain_pre = math.sqrt(2.0)
    gain_mu = math.sqrt(2.0) * 0.01

    w1 = ortho(scale=gain_pre)(k1, (STATE_DIM, HIDDEN_SIZE), jnp.float32)
    b1 = jnp.zeros((1, HIDDEN_SIZE), jnp.float32)
    w2 = ortho(scale=gain_pre)(k2, (HIDDEN_SIZE, HIDDEN_SIZE), jnp.float32)
    b2 = jnp.zeros((1, HIDDEN_SIZE), jnp.float32)

    wmu = ortho(scale=gain_mu)(k3, (HIDDEN_SIZE, ACTION_DIM), jnp.float32)
    bmu = jnp.zeros((1, ACTION_DIM), jnp.float32)
    # sigma head keeps PyTorch's default Linear init (kaiming-uniform stand-in)
    bound = 1.0 / math.sqrt(HIDDEN_SIZE)
    wsg = jax.random.uniform(k4, (HIDDEN_SIZE, ACTION_DIM), jnp.float32,
                             -bound, bound)
    bsg = jax.random.uniform(k5, (1, ACTION_DIM), jnp.float32, -bound, bound)

    # TODO(synk): compute_dists / compute_dists_and_log_probs (Normal /
    # Independent distribution objects and log_prob) are not implemented as
    # kernels.
    return (w1, b1, w2, b2, wmu, bmu, wsg, bsg)


if __name__ == "__main__":
    key = jax.random.PRNGKey(0)
    k_param, k_state, k_eps = jax.random.split(key, 3)

    params = init_params(k_param)
    B = 64
    states = jax.random.normal(k_state, (B, STATE_DIM), jnp.float32)
    eps = jax.random.normal(k_eps, (B, ACTION_DIM), jnp.float32)

    # block_rows=32 -> 2-step batch grid (exercises tiling + parallel split)
    actions_det = gaussian_actor_forward(states, params, deterministic=True,
                                         block_rows=32)
    actions_stoch = gaussian_actor_forward(states, params, deterministic=False,
                                           eps=eps, block_rows=32)
    jax.block_until_ready((actions_det, actions_stoch))

    ref_det = reference_forward(states, params, deterministic=True)
    ref_stoch = reference_forward(states, params, deterministic=False, eps=eps)

    assert actions_det.shape == (B, ACTION_DIM)
    assert actions_stoch.shape == (B, ACTION_DIM)
    assert bool(jnp.allclose(actions_det, ref_det, atol=1e-2, rtol=1e-2))
    assert bool(jnp.allclose(actions_stoch, ref_stoch, atol=2e-2, rtol=2e-2))
    assert bool(jnp.all(jnp.abs(actions_det) <= ACTION_BOUND + 1e-6))
    assert bool(jnp.all(jnp.abs(actions_stoch) <= ACTION_BOUND + 1e-6))
    print("KERNEL_OK")
</pallas_src>

<mosaic_0001>
module attributes {stable_mosaic.version = 11 : i64} {
  func.func @_actor_det_kernel(%arg0: i32, %arg1: memref<32x16xf32, #tpu.memory_space<vmem>>, %arg2: memref<16x32xf32, #tpu.memory_space<vmem>>, %arg3: memref<1x32xf32, #tpu.memory_space<vmem>>, %arg4: memref<32x32xf32, #tpu.memory_space<vmem>>, %arg5: memref<1x32xf32, #tpu.memory_space<vmem>>, %arg6: memref<32x8xf32, #tpu.memory_space<vmem>>, %arg7: memref<1x8xf32, #tpu.memory_space<vmem>>, %arg8: memref<32x8xf32, #tpu.memory_space<vmem>>) attributes {dimension_semantics = [#tpu.dimension_semantics<parallel>], iteration_bounds = array<i64: 2>, scalar_prefetch = 0 : i64, scratch_operands = 0 : i64, tpu.core_type = #tpu.core_type<tc>, window_params = [{transform_indices = @transform_0, window_bounds = array<i64: 32, 16>}, {pipeline_mode = #tpu.pipeline_mode<synchronous>, transform_indices = @transform_1, window_bounds = array<i64: 16, 32>}, {pipeline_mode = #tpu.pipeline_mode<synchronous>, transform_indices = @transform_2, window_bounds = array<i64: 1, 32>}, {pipeline_mode = #tpu.pipeline_mode<synchronous>, transform_indices = @transform_3, window_bounds = array<i64: 32, 32>}, {pipeline_mode = #tpu.pipeline_mode<synchronous>, transform_indices = @transform_4, window_bounds = array<i64: 1, 32>}, {pipeline_mode = #tpu.pipeline_mode<synchronous>, transform_indices = @transform_5, window_bounds = array<i64: 32, 8>}, {pipeline_mode = #tpu.pipeline_mode<synchronous>, transform_indices = @transform_6, window_bounds = array<i64: 1, 8>}, {transform_indices = @transform_7, window_bounds = array<i64: 32, 8>}]} {
    %c0 = arith.constant 0 : index
    %c0_0 = arith.constant 0 : index
    %0 = vector.load %arg1[%c0, %c0_0] : memref<32x16xf32, #tpu.memory_space<vmem>>, vector<32x16xf32>
    %c0_1 = arith.constant 0 : index
    %c0_2 = arith.constant 0 : index
    %1 = vector.load %arg2[%c0_1, %c0_2] : memref<16x32xf32, #tpu.memory_space<vmem>>, vector<16x32xf32>
    %cst = arith.constant dense<0.000000e+00> : vector<32x32xf32>
    %2 = tpu.matmul %0, %1, %cst {dimension_numbers = #tpu.dot_dimension_numbers<[1], [0], [0], [1], [0, 0, 1, 1], [], []>} : vector<32x16xf32>, vector<16x32xf32>, vector<32x32xf32> -> vector<32x32xf32>
    %c0_3 = arith.constant 0 : index
    %c0_4 = arith.constant 0 : index
    %3 = vector.load %arg3[%c0_3, %c0_4] : memref<1x32xf32, #tpu.memory_space<vmem>>, vector<1x32xf32>
    %4 = vector.broadcast %3 : vector<1x32xf32> to vector<32x32xf32>
    %5 = arith.addf %2, %4 : vector<32x32xf32>
    %cst_5 = arith.constant 0.000000e+00 : f32
    %6 = vector.broadcast %cst_5 : f32 to vector<32x32xf32>
    %7 = arith.maximumf %5, %6 : vector<32x32xf32>
    %c0_6 = arith.constant 0 : index
    %c0_7 = arith.constant 0 : index
    %8 = vector.load %arg4[%c0_6, %c0_7] : memref<32x32xf32, #tpu.memory_space<vmem>>, vector<32x32xf32>
    %cst_8 = arith.constant dense<0.000000e+00> : vector<32x32xf32>
    %9 = tpu.matmul %7, %8, %cst_8 {dimension_numbers = #tpu.dot_dimension_numbers<[1], [0], [0], [1], [0, 0, 1, 1], [], []>} : vector<32x32xf32>, vector<32x32xf32>, vector<32x32xf32> -> vector<32x32xf32>
    %c0_9 = arith.constant 0 : index
    %c0_10 = arith.constant 0 : index
    %10 = vector.load %arg5[%c0_9, %c0_10] : memref<1x32xf32, #tpu.memory_space<vmem>>, vector<1x32xf32>
    %11 = vector.broadcast %10 : vector<1x32xf32> to vector<32x32xf32>
    %12 = arith.addf %9, %11 : vector<32x32xf32>
    %cst_11 = arith.constant 0.000000e+00 : f32
    %13 = vector.broadcast %cst_11 : f32 to vector<32x32xf32>
    %14 = arith.maximumf %12, %13 : vector<32x32xf32>
    %c0_12 = arith.constant 0 : index
    %c0_13 = arith.constant 0 : index
    %15 = vector.load %arg6[%c0_12, %c0_13] : memref<32x8xf32, #tpu.memory_space<vmem>>, vector<32x8xf32>
    %cst_14 = arith.constant dense<0.000000e+00> : vector<32x8xf32>
    %16 = tpu.matmul %14, %15, %cst_14 {dimension_numbers = #tpu.dot_dimension_numbers<[1], [0], [0], [1], [0, 0, 1, 1], [], []>} : vector<32x32xf32>, vector<32x8xf32>, vector<32x8xf32> -> vector<32x8xf32>
    %c0_15 = arith.constant 0 : index
    %c0_16 = arith.constant 0 : index
    %17 = vector.load %arg7[%c0_15, %c0_16] : memref<1x8xf32, #tpu.memory_space<vmem>>, vector<1x8xf32>
    %18 = vector.broadcast %17 : vector<1x8xf32> to vector<32x8xf32>
    %19 = arith.addf %16, %18 : vector<32x8xf32>
    %20 = math.tanh %19 : vector<32x8xf32>
    %cst_17 = arith.constant 1.000000e+00 : f32
    %21 = vector.broadcast %cst_17 : f32 to vector<32x8xf32>
    %22 = arith.mulf %21, %20 : vector<32x8xf32>
    %c0_18 = arith.constant 0 : index
    %c0_19 = arith.constant 0 : index
    %23 = vector.load %arg8[%c0_18, %c0_19] : memref<32x8xf32, #tpu.memory_space<vmem>>, vector<32x8xf32>
    tpu.vector_store %arg8[%c0_18, %c0_19], %22 {strides = array<i32>} : memref<32x8xf32, #tpu.memory_space<vmem>>, vector<32x8xf32>,
    return
  }
  func.func @transform_0(%arg0: i32) -> (i32, i32) {
    %c0_i32 = arith.constant 0 : i32
    %c0_i32_0 = arith.constant 0 : i32
    return %arg0, %c0_i32 : i32, i32
  }
  func.func @transform_1(%arg0: i32) -> (i32, i32) {
    %c0_i32 = arith.constant 0 : i32
    %c0_i32_0 = arith.constant 0 : i32
    %c0_i32_1 = arith.constant 0 : i32
    return %c0_i32, %c0_i32_0 : i32, i32
  }
  func.func @transform_2(%arg0: i32) -> (i32, i32) {
    %c0_i32 = arith.constant 0 : i32
    %c0_i32_0 = arith.constant 0 : i32
    %c0_i32_1 = arith.constant 0 : i32
    return %c0_i32, %c0_i32_0 : i32, i32
  }
  func.func @transform_3(%arg0: i32) -> (i32, i32) {
    %c0_i32 = arith.constant 0 : i32
    %c0_i32_0 = arith.constant 0 : i32
    %c0_i32_1 = arith.constant 0 : i32
    return %c0_i32, %c0_i32_0 : i32, i32
  }
  func.func @transform_4(%arg0: i32) -> (i32, i32) {
    %c0_i32 = arith.constant 0 : i32
    %c0_i32_0 = arith.constant 0 : i32
    %c0_i32_1 = arith.constant 0 : i32
    return %c0_i32, %c0_i32_0 : i32, i32
  }
  func.func @transform_5(%arg0: i32) -> (i32, i32) {
    %c0_i32 = arith.constant 0 : i32
    %c0_i32_0 = arith.constant 0 : i32
    %c0_i32_1 = arith.constant 0 : i32
    return %c0_i32, %c0_i32_0 : i32, i32
  }
  func.func @transform_6(%arg0: i32) -> (i32, i32) {
    %c0_i32 = arith.constant 0 : i32
    %c0_i32_0 = arith.constant 0 : i32
    %c0_i32_1 = arith.constant 0 : i32
    return %c0_i32, %c0_i32_0 : i32, i32
  }
  func.func @transform_7(%arg0: i32) -> (i32, i32) {
    %c0_i32 = arith.constant 0 : i32
    %c0_i32_0 = arith.constant 0 : i32
    return %arg0, %c0_i32 : i32, i32
  }
}

</mosaic_0001>

<bundles_post_ra>
// kernel: tpu_custom_call.1
= control target key start
LH: loop header
LB: loop body
LE: loop exit
PB: predicated region body
PF: predicated region fallthrough
CT: control target
= control target key end

     0   :  { %s833_s24 = smov 0   ;;  %s904_s0 = inlined_call_operand.vmem [shape: f32[64,16], index: 0, kind: input, shape index: {}]   ;;  %s905_s1 = inlined_call_operand.vmem [shape: f32[16,32], index: 1, kind: input, shape index: {}]   ;;  %s906_s2 = inlined_call_operand.vmem [shape: f32[1,32], index: 2, kind: input, shape index: {}]   ;;  %s907_s3 = inlined_call_operand.vmem [shape: f32[32,32], index: 3, kind: input, shape index: {}]   ;;  %s908_s4 = inlined_call_operand.vmem [shape: f32[1,32], index: 4, kind: input, shape index: {}]   ;;  %s909_s5 = inlined_call_operand.vmem [shape: f32[32,8], index: 5, kind: input, shape index: {}]   ;;  %s910_s6 = inlined_call_operand.vmem [shape: f32[1,8], index: 6, kind: input, shape index: {}]   ;;  %s911_s7 = inlined_call_operand.vmem [shape: f32[64,8], index: 7, kind: output, shape index: {}]  }
   0x1 LB: > { %s683_s25 = sadd.s32 4294967295, %s791_s24   ;;  %p687_p0 = scmp.ge.s32.totalorder %s791_s24, 1  ;;  %s791_s24 = sphi %s833_s24, %s17_s24  }
   0x2   : > { %p238_p1 = scmp.lt.s32.totalorder %s791_s24, 3 }
   0x4   : > { %p239_p2 = pnand %p687_p0, %p238_p1 }
   0x5   : > { %s688_s30 = sshll.u32 (!%p239_p2), %s683_s25, 2 }
   0x6   : > { %242 = sbr.rel (%p239_p2) target bundleno = 633 (0x279), region = 48  ;;  %p271_p3 = scmp.lt.s32.totalorder (!%p239_p2), %s688_s30, 7 }
   0xb   : > { %v287_v0 = vld [vmem:[%s905_s1 + $0x8] sm:$0xff]  ;;  %v286_v1 = vld [vmem:[%s905_s1] sm:$0xff]  ;;  %s913_s30 = smov (!%p271_p3, %s688_s30), 7  ;;  %vm295_vm0 = vcmask 130048   ;;  %v400_v6 = vld [vmem:[%s907_s3 + $0x18] sm:$0xff]  ;;  %vm408_vm1 = vcmask 261120  }
   0xc   : > { %731 = vmatprep.subr.mxu0 %v287_v0  ;;  %s689_s8 = sshll.u32 %s913_s30, 3  ;;  %741 = vmatprep.subr.mxu1 %v400_v6  ;;  %v399_v7 = vld [vmem:[%s907_s3 + $0x10] sm:$0xff]  ;;  %v398_v8 = vld [vmem:[%s907_s3 + $0x8] sm:$0xff]  ;;  %v397_v9 = vld [vmem:[%s907_s3] sm:$0xff]  ;;  %vm622_vm2 = vcmask 64512  }
   0xd   : > { %732 = vmatpush3.msra.mxu0 %v287_v0  ;;  %s274_s11 = scalar_lea.vmem %s904_s0, %s689_s8  ;;  %742 = vmatpush3.msra.mxu1 %v400_v6  ;;  %v513_v10 = vld [vmem:[%s909_s5 + $0x18] sm:$0xff]  ;;  %v692_v11 = vld [vmem:[%s906_s2] ss:$0 sm:$0xff]  ;;  %v512_v24 = vld [vmem:[%s909_s5 + $0x10] sm:$0xff]  ;;  %s280_s16 = scalar_lea.vmem %s911_s7, %s689_s8 }
   0xe   : > { %733 = vmatprep.subr.mxu0 %v286_v1  ;;  %v282_v2 = vld [vmem:[%s274_s11] sm:$0xff]  ;;  %v283_v3 = vld [vmem:[%s274_s11 + $0x8] sm:$0xff]  ;;  %v284_v4 = vld [vmem:[%s274_s11 + $0x10] sm:$0xff]  ;;  %743 = vmatprep.subr.mxu1 %v399_v7 }
   0xf   : > { %734 = vmatpush3.msra.mxu0 %v286_v1  ;;  %735 = vmatprep.mubr.msk.f32.mxu0 %vm295_vm0, %v282_v2  ;;  %v285_v5 = vld [vmem:[%s274_s11 + $0x18] sm:$0xff]  ;;  %v511_v25 = vld [vmem:[%s909_s5 + $0x8] sm:$0xff]  ;;  %v510_v26 = vld [vmem:[%s909_s5] sm:$0xff] }
  0x10   : > { %736 = vmatmul.mubr.msk.f32.vlgmr.msra.gmra.mxu0 %vm295_vm0, %v283_v3  ;;  %744 = vmatpush3.msra.mxu1 %v399_v7  ;;  %v697_v27 = vld [vmem:[%s908_s4] ss:$0 sm:$0xff] }
  0x11   : > { %738 = vmatprep.mubr.msk.f32.mxu0 %vm295_vm0, %v284_v4  ;;  %745 = vmatprep.subr.mxu1 %v398_v8  ;;  %v702_v40 = vld [vmem:[%s910_s6] ss:$0 sm:$0xff] }
  0x12   : > { %746 = vmatpush3.msra.mxu1 %v398_v8  ;;  %755 = vmatprep.subr.mxu0 %v513_v10 }
  0x13   : > { %747 = vmatprep.subr.mxu1 %v397_v9  ;;  %756 = vmatpush3.msra.mxu0 %v513_v10 }
  0x14   : > { %739 = vmatmul.mubr.msk.f32.gmra.mxu0 %vm295_vm0, %v285_v5  ;;  %748 = vmatpush3.msra.mxu1 %v397_v9 }
  0x15   : > { %757 = vmatprep.subr.mxu0 %v512_v24 }
  0x16   : > { %758 = vmatpush3.msra.mxu0 %v512_v24 }
  0x17   : > { %759 = vmatprep.subr.mxu0 %v511_v25 }
  0x18   : > { %760 = vmatpush3.msra.mxu0 %v511_v25 }
  0x19   : > { %761 = vmatprep.subr.mxu0 %v510_v26 }
  0x1a   : > { %762 = vmatpush3.msra.mxu0 %v510_v26 }
  0xd0   : > { %v737_v12 = vpop.f32.mrf.mxu0 }
  0xd1   : > { %v380_v13 = vadd.f32 %v737_v12, %v692_v11 }
  0xd2   : > { %v374_v14 = vpop.f32.mrf.mxu0 }
  0xd3   : > { %v375_v15 = vadd.f32 %v692_v11, %v374_v14  ;;  %v394_v18 = vmax.f32 %v380_v13, 0.0 }
  0xd4   : > { %v740_v16 = vpop.f32.mrf.mxu0 }
  0xd5   : > { %v393_v17 = vmax.f32 %v375_v15, 0.0  ;;  %v390_v19 = vadd.f32 %v740_v16, %v692_v11 }
  0xd6   : > { %v384_v20 = vpop.f32.mrf.mxu0 }
  0xd7   : > { %v385_v21 = vadd.f32 %v692_v11, %v384_v20  ;;  %749 = vmatprep.mubr.msk.f32.mxu1 %vm408_vm1, %v393_v17  ;;  %v396_v23 = vmax.f32 %v390_v19, 0.0 }
  0xd8   : > { %750 = vmatmul.mubr.msk.f32.vlgmr.msra.gmra.mxu1 %vm408_vm1, %v394_v18 }
  0xd9   : > { %v395_v22 = vmax.f32 %v385_v21, 0.0 }
  0xdb   : > { %752 = vmatprep.mubr.msk.f32.mxu1 %vm408_vm1, %v395_v22 }
  0xdc   : > { %753 = vmatmul.mubr.msk.f32.gmra.mxu1 %vm408_vm1, %v396_v23 }
 0x198   : > { %v751_v28 = vpop.f32.mrf.mxu1 }
 0x199   : > { %v493_v29 = vadd.f32 %v751_v28, %v697_v27 }
 0x19a   : > { %v487_v30 = vpop.f32.mrf.mxu1 }
 0x19b   : > { %v488_v31 = vadd.f32 %v697_v27, %v487_v30  ;;  %v507_v34 = vmax.f32 %v493_v29, 0.0 }
 0x19c   : > { %v754_v32 = vpop.f32.mrf.mxu1 }
 0x19d   : > { %v506_v33 = vmax.f32 %v488_v31, 0.0  ;;  %v503_v35 = vadd.f32 %v754_v32, %v697_v27 }
 0x19e   : > { %v497_v36 = vpop.f32.mrf.mxu1 }
 0x19f   : > { %v498_v37 = vadd.f32 %v697_v27, %v497_v36  ;;  %763 = vmatprep.mubr.msk.f32.mxu0 %vm408_vm1, %v506_v33  ;;  %v509_v39 = vmax.f32 %v503_v35, 0.0 }
 0x1a0   : > { %764 = vmatmul.mubr.msk.f32.vlgmr.msra.gmra.mxu0 %vm408_vm1, %v507_v34 }
 0x1a1   : > { %v508_v38 = vmax.f32 %v498_v37, 0.0 }
 0x1a3   : > { %766 = vmatprep.mubr.msk.f32.mxu0 %vm408_vm1, %v508_v38 }
 0x1a4   : > { %767 = vmatmul.mubr.msk.f32.gmra.mxu0 %vm408_vm1, %v509_v39 }
 0x260   : > { %v765_v41 = vpop.f32.mrf.mxu0 }
 0x261   : > { %v605_v42 = vadd.f32 %v765_v41, %v702_v40 }
 0x262   : > { %v599_v43 = vpop.f32.mrf.mxu0 }
 0x263   : > { %v600_v44 = vadd.f32 %v702_v40, %v599_v43 }
 0x264   : > { %v768_v45 = vpop.f32.mrf.mxu0 }
 0x265   : > { %777 = vtanh.f32 %v600_v44  ;;  %v615_v46 = vadd.f32 %v768_v45, %v702_v40 }
 0x266   : > { %779 = vtanh.f32 %v605_v42  ;;  %v609_v47 = vpop.f32.mrf.mxu0 }
 0x267   : > { %v610_v48 = vadd.f32 %v702_v40, %v609_v47 }
 0x269   : > { %781 = vtanh.f32 %v610_v48 }
 0x26a   : > { %783 = vtanh.f32 %v615_v46 }
 0x272   : > { %v778_v49 = vpop.eup %777 }
 0x273   : > { %v780_v50 = vpop.eup %779  ;;  %623 = vst.msk [vmem:[%s280_s16] sm:$0xff] %vm622_vm2, %v778_v49 }
 0x274   : > { %624 = vst.msk [vmem:[%s280_s16 + $0x8] sm:$0xff] %vm622_vm2, %v780_v50 }
 0x276   : > { %v782_v51 = vpop.eup %781 }
 0x277   : > { %v784_v52 = vpop.eup %783  ;;  %625 = vst.msk [vmem:[%s280_s16 + $0x10] sm:$0xff] %vm622_vm2, %v782_v51 }
 0x278   : > { %626 = vst.msk [vmem:[%s280_s16 + $0x18] sm:$0xff] %vm622_vm2, %v784_v52 }
 0x279 PF: > { %s17_s24 = sadd.s32 1, %s791_s24  }
 0x27a   : > { %p14_p4 = scmp.ge.s32.totalorder %s17_s24, 4  }
 0x27c   :  { %16 = sbr.rel (!%p14_p4) target bundleno = 1 (0x1), region = 78 }

</bundles_post_ra>
